<compile_context>
chip_gen: v7x
topology: tpu7x:2x2x1
jax: 0.10.0
libtpu: 0.0.40
codegen_flags: <defaults>
</compile_context>

<pallas_src>
import math
from functools import partial

import jax
import jax.numpy as jnp
from jax.experimental import pallas as pl
from jax.experimental.pallas import tpu as pltpu


def _round_up(x, m):
    return (x + m - 1) // m * m


def _mha_kernel(q_ref, k_ref, v_ref,
                wq_ref, bq_ref, wk_ref, bk_ref, wv_ref, bv_ref,
                wo_ref, bo_ref,
                o_ref,
                *, num_heads, dim_q, dim_k, matmul_dtype):
    TB, S, Dp = q_ref.shape          # batch tile, sequence, padded feature dim
    R = TB * S

    def mm(a, b):
        if matmul_dtype is not None:
            a = a.astype(matmul_dtype)
            b = b.astype(matmul_dtype)
        return jnp.dot(a, b, preferred_element_type=jnp.float32)

    def bmm(spec, a, b):
        if matmul_dtype is not None:
            a = a.astype(matmul_dtype)
            b = b.astype(matmul_dtype)
        return jnp.einsum(spec, a, b, preferred_element_type=jnp.float32)

    # ---- head-batched projections (one matmul + one bias broadcast each) ----
    xq = q_ref[...].reshape(R, Dp)
    xk = k_ref[...].reshape(R, Dp)
    xv = v_ref[...].reshape(R, Dp)

    q_all = mm(xq, wq_ref[...]) + bq_ref[...]    # (R, H*dq); scale pre-folded
    k_all = mm(xk, wk_ref[...]) + bk_ref[...]    # (R, H*dk)
    v_all = mm(xv, wv_ref[...]) + bv_ref[...]    # (R, H*dk)

    acc = jnp.zeros((R, Dp), dtype=jnp.float32)

    for h in range(num_heads):                   # H is small & static: unrolled
        q_h = q_all[:, h * dim_q:(h + 1) * dim_q].reshape(TB, S, dim_q)
        k_h = k_all[:, h * dim_k:(h + 1) * dim_k].reshape(TB, S, dim_k)
        v_h = v_all[:, h * dim_k:(h + 1) * dim_k].reshape(TB, S, dim_k)

        # Scaled dot-product attention (scale already folded into Wq/bq);
        # contraction over the trailing feature dim, no explicit transpose.
        s = bmm('bqd,bkd->bqk', q_h, k_h)        # (TB, S, S), float32
        m = jnp.max(s, axis=-1, keepdims=True)
        p = jnp.exp(s - m)
        p = p * pl.reciprocal(jnp.sum(p, axis=-1, keepdims=True), approx=True)

        head_out = bmm('bqk,bkd->bqd', p, v_h)   # (TB, S, dim_k)

        # Distributed output projection:
        #   concat([h0..hH]) @ Wo == sum_h head_out_h @ Wo[h*dk:(h+1)*dk, :]
        acc = acc + mm(head_out.reshape(R, dim_k),
                       wo_ref[h * dim_k:(h + 1) * dim_k, :])

    acc = acc + bo_ref[...]                      # (1, Dp) broadcast, once
    o_ref[...] = acc.reshape(TB, S, Dp).astype(o_ref.dtype)


def multi_head_attention(query, key, value, params, *, num_heads, dim_q, dim_k,
                         block_b=None, matmul_dtype=None):
    B, S, dim_in = query.shape
    wq, bq, wk, bk, wv, bv, wo, bo = params
    Hdq = num_heads * dim_q
    Hdk = num_heads * dim_k

    # ---- one-time parameter prep (outside the kernel) -----------------------
    # Stack per-head weights along the output axis so each projection is a
    # single matmul over all heads; fold the attention scale into Wq / bq.
    scale = 1.0 / math.sqrt(float(dim_q))
    wq2 = jnp.transpose(wq, (1, 0, 2)).reshape(dim_in, Hdq) * scale
    bq2 = (bq * scale).reshape(1, Hdq)
    wk2 = jnp.transpose(wk, (1, 0, 2)).reshape(dim_in, Hdk)
    bk2 = bk.reshape(1, Hdk)
    wv2 = jnp.transpose(wv, (1, 0, 2)).reshape(dim_in, Hdk)
    bv2 = bv.reshape(1, Hdk)
    wo2 = wo
    bo2 = bo.reshape(1, dim_in)

    # ---- lane-dense padding of the feature dim to a multiple of 128 ---------
    Dp = _round_up(dim_in, 128)
    pad_d = Dp - dim_in
    if pad_d:
        query = jnp.pad(query, ((0, 0), (0, 0), (0, pad_d)))
        key = jnp.pad(key, ((0, 0), (0, 0), (0, pad_d)))
        value = jnp.pad(value, ((0, 0), (0, 0), (0, pad_d)))
        wq2 = jnp.pad(wq2, ((0, pad_d), (0, 0)))
        wk2 = jnp.pad(wk2, ((0, pad_d), (0, 0)))
        wv2 = jnp.pad(wv2, ((0, pad_d), (0, 0)))
        wo2 = jnp.pad(wo2, ((0, 0), (0, pad_d)))
        bo2 = jnp.pad(bo2, ((0, 0), (0, pad_d)))

    # ---- batch tiling: several batch elements per grid step -----------------
    if block_b is None:
        block_b = max(1, min(B, 8))
    Bp = _round_up(B, block_b)
    pad_b = Bp - B
    if pad_b:
        query = jnp.pad(query, ((0, pad_b), (0, 0), (0, 0)))
        key = jnp.pad(key, ((0, pad_b), (0, 0), (0, 0)))
        value = jnp.pad(value, ((0, pad_b), (0, 0), (0, 0)))

    kernel = partial(_mha_kernel, num_heads=num_heads, dim_q=dim_q, dim_k=dim_k,
                     matmul_dtype=matmul_dtype)

    seq_spec = pl.BlockSpec((block_b, S, Dp), lambda b: (b, 0, 0))
    full2 = lambda arr: pl.BlockSpec(arr.shape, lambda b: (0, 0))

    out = pl.pallas_call(
        kernel,
        out_shape=jax.ShapeDtypeStruct((Bp, S, Dp), query.dtype),
        grid_spec=pltpu.PrefetchScalarGridSpec(
            num_scalar_prefetch=0,
            grid=(Bp // block_b,),
            in_specs=[
                seq_spec, seq_spec, seq_spec,        # query, key, value
                full2(wq2), full2(bq2),              # Wq, bq   (scaled, stacked)
                full2(wk2), full2(bk2),              # Wk, bk
                full2(wv2), full2(bv2),              # Wv, bv
                full2(wo2), full2(bo2),              # Wo, bo
            ],
            out_specs=pl.BlockSpec((block_b, S, Dp), lambda b: (b, 0, 0)),
        ),
        compiler_params=pltpu.CompilerParams(dimension_semantics=("parallel",)),
    )(query, key, value, wq2, bq2, wk2, bk2, wv2, bv2, wo2, bo2)

    return out[:B, :, :dim_in]


def init_params(key, num_heads, dim_in, dim_q, dim_k, dtype=jnp.float32):
    ks = jax.random.split(key, 8)
    std = 0.05
    wq = std * jax.random.normal(ks[0], (num_heads, dim_in, dim_q), dtype)
    bq = std * jax.random.normal(ks[1], (num_heads, dim_q), dtype)
    wk = std * jax.random.normal(ks[2], (num_heads, dim_in, dim_k), dtype)
    bk = std * jax.random.normal(ks[3], (num_heads, dim_k), dtype)
    wv = std * jax.random.normal(ks[4], (num_heads, dim_in, dim_k), dtype)
    bv = std * jax.random.normal(ks[5], (num_heads, dim_k), dtype)
    wo = std * jax.random.normal(ks[6], (num_heads * dim_k, dim_in), dtype)
    bo = std * jax.random.normal(ks[7], (1, dim_in), dtype)
    return (wq, bq, wk, bk, wv, bv, wo, bo)


def mha_reference(query, key, value, params, *, num_heads, dim_q, dim_k):
    """Pure-JAX reference mirroring the PyTorch module, for a sanity check."""
    wq, bq, wk, bk, wv, bv, wo, bo = params
    outs = []
    for h in range(num_heads):
        q = query @ wq[h] + bq[h]
        k = key @ wk[h] + bk[h]
        v = value @ wv[h] + bv[h]
        scores = jnp.einsum("bsd,btd->bst", q, k) / math.sqrt(dim_q)
        p = jax.nn.softmax(scores, axis=-1)
        outs.append(jnp.einsum("bst,btd->bsd", p, v))
    cat = jnp.concatenate(outs, axis=-1)
    return cat @ wo + bo[0]


if __name__ == "__main__":
    num_heads, dim_in, dim_q, dim_k = 4, 32, 16, 16
    B, S = 2, 8

    root = jax.random.PRNGKey(0)
    kq, kk, kv, kp = jax.random.split(root, 4)
    query = jax.random.normal(kq, (B, S, dim_in), jnp.float32)
    key = jax.random.normal(kk, (B, S, dim_in), jnp.float32)
    value = jax.random.normal(kv, (B, S, dim_in), jnp.float32)
    params = init_params(kp, num_heads, dim_in, dim_q, dim_k)

    out = multi_head_attention(query, key, value, params,
                               num_heads=num_heads, dim_q=dim_q, dim_k=dim_k)
    out = jax.block_until_ready(out)

    ref = mha_reference(query, key, value, params,
                        num_heads=num_heads, dim_q=dim_q, dim_k=dim_k)
    assert out.shape == (B, S, dim_in)
    # Slightly relaxed tolerance: approx=True reciprocal in the softmax.
    assert jnp.allclose(out, ref, atol=2e-3, rtol=2e-3), "mismatch vs reference"

    print("KERNEL_OK")
</pallas_src>

<mosaic_0001>
module attributes {stable_mosaic.version = 11 : i64} {
  func.func @_mha_kernel(%arg0: i32, %arg1: memref<2x8x128xf32, #tpu.memory_space<vmem>>, %arg2: memref<2x8x128xf32, #tpu.memory_space<vmem>>, %arg3: memref<2x8x128xf32, #tpu.memory_space<vmem>>, %arg4: memref<128x64xf32, #tpu.memory_space<vmem>>, %arg5: memref<1x64xf32, #tpu.memory_space<vmem>>, %arg6: memref<128x64xf32, #tpu.memory_space<vmem>>, %arg7: memref<1x64xf32, #tpu.memory_space<vmem>>, %arg8: memref<128x64xf32, #tpu.memory_space<vmem>>, %arg9: memref<1x64xf32, #tpu.memory_space<vmem>>, %arg10: memref<64x128xf32, #tpu.memory_space<vmem>>, %arg11: memref<1x128xf32, #tpu.memory_space<vmem>>, %arg12: memref<2x8x128xf32, #tpu.memory_space<vmem>>) attributes {dimension_semantics = [#tpu.dimension_semantics<parallel>], iteration_bounds = array<i64: 1>, scalar_prefetch = 0 : i64, scratch_operands = 0 : i64, tpu.core_type = #tpu.core_type<tc>, window_params = [{transform_indices = @transform_0, window_bounds = array<i64: 2, 8, 128>}, {transform_indices = @transform_1, window_bounds = array<i64: 2, 8, 128>}, {transform_indices = @transform_2, window_bounds = array<i64: 2, 8, 128>}, {pipeline_mode = #tpu.pipeline_mode<synchronous>, transform_indices = @transform_3, window_bounds = array<i64: 128, 64>}, {pipeline_mode = #tpu.pipeline_mode<synchronous>, transform_indices = @transform_4, window_bounds = array<i64: 1, 64>}, {pipeline_mode = #tpu.pipeline_mode<synchronous>, transform_indices = @transform_5, window_bounds = array<i64: 128, 64>}, {pipeline_mode = #tpu.pipeline_mode<synchronous>, transform_indices = @transform_6, window_bounds = array<i64: 1, 64>}, {pipeline_mode = #tpu.pipeline_mode<synchronous>, transform_indices = @transform_7, window_bounds = array<i64: 128, 64>}, {pipeline_mode = #tpu.pipeline_mode<synchronous>, transform_indices = @transform_8, window_bounds = array<i64: 1, 64>}, {pipeline_mode = #tpu.pipeline_mode<synchronous>, transform_indices = @transform_9, window_bounds = array<i64: 64, 128>}, {pipeline_mode = #tpu.pipeline_mode<synchronous>, transform_indices = @transform_10, window_bounds = array<i64: 1, 128>}, {transform_indices = @transform_11, window_bounds = array<i64: 2, 8, 128>}]} {
    %c0 = arith.constant 0 : index
    %c0_0 = arith.constant 0 : index
    %c0_1 = arith.constant 0 : index
    %0 = vector.load %arg1[%c0, %c0_0, %c0_1] : memref<2x8x128xf32, #tpu.memory_space<vmem>>, vector<2x8x128xf32>
    %1 = vector.shape_cast %0 : vector<2x8x128xf32> to vector<16x128xf32>
    %c0_2 = arith.constant 0 : index
    %c0_3 = arith.constant 0 : index
    %c0_4 = arith.constant 0 : index
    %2 = vector.load %arg2[%c0_2, %c0_3, %c0_4] : memref<2x8x128xf32, #tpu.memory_space<vmem>>, vector<2x8x128xf32>
    %3 = vector.shape_cast %2 : vector<2x8x128xf32> to vector<16x128xf32>
    %c0_5 = arith.constant 0 : index
    %c0_6 = arith.constant 0 : index
    %c0_7 = arith.constant 0 : index
    %4 = vector.load %arg3[%c0_5, %c0_6, %c0_7] : memref<2x8x128xf32, #tpu.memory_space<vmem>>, vector<2x8x128xf32>
    %5 = vector.shape_cast %4 : vector<2x8x128xf32> to vector<16x128xf32>
    %c0_8 = arith.constant 0 : index
    %c0_9 = arith.constant 0 : index
    %6 = vector.load %arg4[%c0_8, %c0_9] : memref<128x64xf32, #tpu.memory_space<vmem>>, vector<128x64xf32>
    %cst = arith.constant dense<0.000000e+00> : vector<16x64xf32>
    %7 = tpu.matmul %1, %6, %cst {dimension_numbers = #tpu.dot_dimension_numbers<[1], [0], [0], [1], [0, 0, 1, 1], [], []>} : vector<16x128xf32>, vector<128x64xf32>, vector<16x64xf32> -> vector<16x64xf32>
    %c0_10 = arith.constant 0 : index
    %c0_11 = arith.constant 0 : index
    %8 = vector.load %arg5[%c0_10, %c0_11] : memref<1x64xf32, #tpu.memory_space<vmem>>, vector<1x64xf32>
    %9 = vector.broadcast %8 : vector<1x64xf32> to vector<16x64xf32>
    %10 = arith.addf %7, %9 : vector<16x64xf32>
    %c0_12 = arith.constant 0 : index
    %c0_13 = arith.constant 0 : index
    %11 = vector.load %arg6[%c0_12, %c0_13] : memref<128x64xf32, #tpu.memory_space<vmem>>, vector<128x64xf32>
    %cst_14 = arith.constant dense<0.000000e+00> : vector<16x64xf32>
    %12 = tpu.matmul %3, %11, %cst_14 {dimension_numbers = #tpu.dot_dimension_numbers<[1], [0], [0], [1], [0, 0, 1, 1], [], []>} : vector<16x128xf32>, vector<128x64xf32>, vector<16x64xf32> -> vector<16x64xf32>
    %c0_15 = arith.constant 0 : index
    %c0_16 = arith.constant 0 : index
    %13 = vector.load %arg7[%c0_15, %c0_16] : memref<1x64xf32, #tpu.memory_space<vmem>>, vector<1x64xf32>
    %14 = vector.broadcast %13 : vector<1x64xf32> to vector<16x64xf32>
    %15 = arith.addf %12, %14 : vector<16x64xf32>
    %c0_17 = arith.constant 0 : index
    %c0_18 = arith.constant 0 : index
    %16 = vector.load %arg8[%c0_17, %c0_18] : memref<128x64xf32, #tpu.memory_space<vmem>>, vector<128x64xf32>
    %cst_19 = arith.constant dense<0.000000e+00> : vector<16x64xf32>
    %17 = tpu.matmul %5, %16, %cst_19 {dimension_numbers = #tpu.dot_dimension_numbers<[1], [0], [0], [1], [0, 0, 1, 1], [], []>} : vector<16x128xf32>, vector<128x64xf32>, vector<16x64xf32> -> vector<16x64xf32>
    %c0_20 = arith.constant 0 : index
    %c0_21 = arith.constant 0 : index
    %18 = vector.load %arg9[%c0_20, %c0_21] : memref<1x64xf32, #tpu.memory_space<vmem>>, vector<1x64xf32>
    %19 = vector.broadcast %18 : vector<1x64xf32> to vector<16x64xf32>
    %20 = arith.addf %17, %19 : vector<16x64xf32>
    %cst_22 = arith.constant 0.000000e+00 : f32
    %21 = vector.broadcast %cst_22 : f32 to vector<16x128xf32>
    %22 = vector.extract_strided_slice %10 {offsets = [0, 0], sizes = [16, 16], strides = [1, 1]} : vector<16x64xf32> to vector<16x16xf32>
    %23 = vector.shape_cast %22 : vector<16x16xf32> to vector<2x8x16xf32>
    %24 = vector.extract_strided_slice %15 {offsets = [0, 0], sizes = [16, 16], strides = [1, 1]} : vector<16x64xf32> to vector<16x16xf32>
    %25 = vector.shape_cast %24 : vector<16x16xf32> to vector<2x8x16xf32>
    %26 = vector.extract_strided_slice %20 {offsets = [0, 0], sizes = [16, 16], strides = [1, 1]} : vector<16x64xf32> to vector<16x16xf32>
    %27 = vector.shape_cast %26 : vector<16x16xf32> to vector<2x8x16xf32>
    "tpu.trace_start"() <{level = 10 : i32, message = "bqd,bkd->bqk"}> : () -> ()
    %cst_23 = arith.constant dense<0.000000e+00> : vector<2x8x8xf32>
    %28 = tpu.matmul %23, %25, %cst_23 {dimension_numbers = #tpu.dot_dimension_numbers<[2], [2], [1], [1], [0, 0, 0, 1, 1, 1], [0], [0]>} : vector<2x8x16xf32>, vector<2x8x16xf32>, vector<2x8x8xf32> -> vector<2x8x8xf32>
    "tpu.trace_stop"() : () -> ()
    %cst_24 = arith.constant dense<0xFF800000> : vector<2x8xf32>
    %29 = vector.multi_reduction <maximumf>, %28, %cst_24 [2] : vector<2x8x8xf32> to vector<2x8xf32>
    %30 = vector.shape_cast %29 : vector<2x8xf32> to vector<2x8x1xf32>
    %31 = vector.broadcast %30 : vector<2x8x1xf32> to vector<2x8x8xf32>
    %32 = arith.subf %28, %31 : vector<2x8x8xf32>
    %33 = math.exp %32 : vector<2x8x8xf32>
    %cst_25 = arith.constant dense<0.000000e+00> : vector<2x8xf32>
    %34 = vector.multi_reduction <add>, %33, %cst_25 [2] : vector<2x8x8xf32> to vector<2x8xf32>
    %35 = vector.shape_cast %34 : vector<2x8xf32> to vector<2x8x1xf32>
    %36 = tpu.reciprocal %35 {approx = true} : vector<2x8x1xf32> -> vector<2x8x1xf32>
    %37 = vector.broadcast %36 : vector<2x8x1xf32> to vector<2x8x8xf32>
    %38 = arith.mulf %33, %37 : vector<2x8x8xf32>
    "tpu.trace_start"() <{level = 10 : i32, message = "bqk,bkd->bqd"}> : () -> ()
    %cst_26 = arith.constant dense<0.000000e+00> : vector<2x8x16xf32>
    %39 = tpu.matmul %38, %27, %cst_26 {dimension_numbers = #tpu.dot_dimension_numbers<[2], [1], [1], [2], [0, 0, 0, 1, 1, 2], [0], [0]>} : vector<2x8x8xf32>, vector<2x8x16xf32>, vector<2x8x16xf32> -> vector<2x8x16xf32>
    "tpu.trace_stop"() : () -> ()
    %40 = vector.shape_cast %39 : vector<2x8x16xf32> to vector<16x16xf32>
    %c0_27 = arith.constant 0 : index
    %c0_28 = arith.constant 0 : index
    %41 = vector.load %arg10[%c0_27, %c0_28] : memref<64x128xf32, #tpu.memory_space<vmem>>, vector<16x128xf32>
    %cst_29 = arith.constant dense<0.000000e+00> : vector<16x128xf32>
    %42 = tpu.matmul %40, %41, %cst_29 {dimension_numbers = #tpu.dot_dimension_numbers<[1], [0], [0], [1], [0, 0, 1, 1], [], []>} : vector<16x16xf32>, vector<16x128xf32>, vector<16x128xf32> -> vector<16x128xf32>
    %43 = arith.addf %21, %42 : vector<16x128xf32>
    %44 = vector.extract_strided_slice %10 {offsets = [0, 16], sizes = [16, 16], strides = [1, 1]} : vector<16x64xf32> to vector<16x16xf32>
    %45 = vector.shape_cast %44 : vector<16x16xf32> to vector<2x8x16xf32>
    %46 = vector.extract_strided_slice %15 {offsets = [0, 16], sizes = [16, 16], strides = [1, 1]} : vector<16x64xf32> to vector<16x16xf32>
    %47 = vector.shape_cast %46 : vector<16x16xf32> to vector<2x8x16xf32>
    %48 = vector.extract_strided_slice %20 {offsets = [0, 16], sizes = [16, 16], strides = [1, 1]} : vector<16x64xf32> to vector<16x16xf32>
    %49 = vector.shape_cast %48 : vector<16x16xf32> to vector<2x8x16xf32>
    "tpu.trace_start"() <{level = 10 : i32, message = "bqd,bkd->bqk"}> : () -> ()
    %cst_30 = arith.constant dense<0.000000e+00> : vector<2x8x8xf32>
    %50 = tpu.matmul %45, %47, %cst_30 {dimension_numbers = #tpu.dot_dimension_numbers<[2], [2], [1], [1], [0, 0, 0, 1, 1, 1], [0], [0]>} : vector<2x8x16xf32>, vector<2x8x16xf32>, vector<2x8x8xf32> -> vector<2x8x8xf32>
    "tpu.trace_stop"() : () -> ()
    %cst_31 = arith.constant dense<0xFF800000> : vector<2x8xf32>
    %51 = vector.multi_reduction <maximumf>, %50, %cst_31 [2] : vector<2x8x8xf32> to vector<2x8xf32>
    %52 = vector.shape_cast %51 : vector<2x8xf32> to vector<2x8x1xf32>
    %53 = vector.broadcast %52 : vector<2x8x1xf32> to vector<2x8x8xf32>
    %54 = arith.subf %50, %53 : vector<2x8x8xf32>
    %55 = math.exp %54 : vector<2x8x8xf32>
    %cst_32 = arith.constant dense<0.000000e+00> : vector<2x8xf32>
    %56 = vector.multi_reduction <add>, %55, %cst_32 [2] : vector<2x8x8xf32> to vector<2x8xf32>
    %57 = vector.shape_cast %56 : vector<2x8xf32> to vector<2x8x1xf32>
    %58 = tpu.reciprocal %57 {approx = true} : vector<2x8x1xf32> -> vector<2x8x1xf32>
    %59 = vector.broadcast %58 : vector<2x8x1xf32> to vector<2x8x8xf32>
    %60 = arith.mulf %55, %59 : vector<2x8x8xf32>
    "tpu.trace_start"() <{level = 10 : i32, message = "bqk,bkd->bqd"}> : () -> ()
    %cst_33 = arith.constant dense<0.000000e+00> : vector<2x8x16xf32>
    %61 = tpu.matmul %60, %49, %cst_33 {dimension_numbers = #tpu.dot_dimension_numbers<[2], [1], [1], [2], [0, 0, 0, 1, 1, 2], [0], [0]>} : vector<2x8x8xf32>, vector<2x8x16xf32>, vector<2x8x16xf32> -> vector<2x8x16xf32>
    "tpu.trace_stop"() : () -> ()
    %62 = vector.shape_cast %61 : vector<2x8x16xf32> to vector<16x16xf32>
    %c16 = arith.constant 16 : index
    %c0_34 = arith.constant 0 : index
    %63 = vector.load %arg10[%c16, %c0_34] : memref<64x128xf32, #tpu.memory_space<vmem>>, vector<16x128xf32>
    %cst_35 = arith.constant dense<0.000000e+00> : vector<16x128xf32>
    %64 = tpu.matmul %62, %63, %cst_35 {dimension_numbers = #tpu.dot_dimension_numbers<[1], [0], [0], [1], [0, 0, 1, 1], [], []>} : vector<16x16xf32>, vector<16x128xf32>, vector<16x128xf32> -> vector<16x128xf32>
    %65 = arith.addf %43, %64 : vector<16x128xf32>
    %66 = vector.extract_strided_slice %10 {offsets = [0, 32], sizes = [16, 16], strides = [1, 1]} : vector<16x64xf32> to vector<16x16xf32>
    %67 = vector.shape_cast %66 : vector<16x16xf32> to vector<2x8x16xf32>
    %68 = vector.extract_strided_slice %15 {offsets = [0, 32], sizes = [16, 16], strides = [1, 1]} : vector<16x64xf32> to vector<16x16xf32>
    %69 = vector.shape_cast %68 : vector<16x16xf32> to vector<2x8x16xf32>
    %70 = vector.extract_strided_slice %20 {offsets = [0, 32], sizes = [16, 16], strides = [1, 1]} : vector<16x64xf32> to vector<16x16xf32>
    %71 = vector.shape_cast %70 : vector<16x16xf32> to vector<2x8x16xf32>
    "tpu.trace_start"() <{level = 10 : i32, message = "bqd,bkd->bqk"}> : () -> ()
    %cst_36 = arith.constant dense<0.000000e+00> : vector<2x8x8xf32>
    %72 = tpu.matmul %67, %69, %cst_36 {dimension_numbers = #tpu.dot_dimension_numbers<[2], [2], [1], [1], [0, 0, 0, 1, 1, 1], [0], [0]>} : vector<2x8x16xf32>, vector<2x8x16xf32>, vector<2x8x8xf32> -> vector<2x8x8xf32>
    "tpu.trace_stop"() : () -> ()
    %cst_37 = arith.constant dense<0xFF800000> : vector<2x8xf32>
    %73 = vector.multi_reduction <maximumf>, %72, %cst_37 [2] : vector<2x8x8xf32> to vector<2x8xf32>
    %74 = vector.shape_cast %73 : vector<2x8xf32> to vector<2x8x1xf32>
    %75 = vector.broadcast %74 : vector<2x8x1xf32> to vector<2x8x8xf32>
    %76 = arith.subf %72, %75 : vector<2x8x8xf32>
    %77 = math.exp %76 : vector<2x8x8xf32>
    %cst_38 = arith.constant dense<0.000000e+00> : vector<2x8xf32>
    %78 = vector.multi_reduction <add>, %77, %cst_38 [2] : vector<2x8x8xf32> to vector<2x8xf32>
    %79 = vector.shape_cast %78 : vector<2x8xf32> to vector<2x8x1xf32>
    %80 = tpu.reciprocal %79 {approx = true} : vector<2x8x1xf32> -> vector<2x8x1xf32>
    %81 = vector.broadcast %80 : vector<2x8x1xf32> to vector<2x8x8xf32>
    %82 = arith.mulf %77, %81 : vector<2x8x8xf32>
    "tpu.trace_start"() <{level = 10 : i32, message = "bqk,bkd->bqd"}> : () -> ()
    %cst_39 = arith.constant dense<0.000000e+00> : vector<2x8x16xf32>
    %83 = tpu.matmul %82, %71, %cst_39 {dimension_numbers = #tpu.dot_dimension_numbers<[2], [1], [1], [2], [0, 0, 0, 1, 1, 2], [0], [0]>} : vector<2x8x8xf32>, vector<2x8x16xf32>, vector<2x8x16xf32> -> vector<2x8x16xf32>
    "tpu.trace_stop"() : () -> ()
    %84 = vector.shape_cast %83 : vector<2x8x16xf32> to vector<16x16xf32>
    %c32 = arith.constant 32 : index
    %c0_40 = arith.constant 0 : index
    %85 = vector.load %arg10[%c32, %c0_40] : memref<64x128xf32, #tpu.memory_space<vmem>>, vector<16x128xf32>
    %cst_41 = arith.constant dense<0.000000e+00> : vector<16x128xf32>
    %86 = tpu.matmul %84, %85, %cst_41 {dimension_numbers = #tpu.dot_dimension_numbers<[1], [0], [0], [1], [0, 0, 1, 1], [], []>} : vector<16x16xf32>, vector<16x128xf32>, vector<16x128xf32> -> vector<16x128xf32>
    %87 = arith.addf %65, %86 : vector<16x128xf32>
    %88 = vector.extract_strided_slice %10 {offsets = [0, 48], sizes = [16, 16], strides = [1, 1]} : vector<16x64xf32> to vector<16x16xf32>
    %89 = vector.shape_cast %88 : vector<16x16xf32> to vector<2x8x16xf32>
    %90 = vector.extract_strided_slice %15 {offsets = [0, 48], sizes = [16, 16], strides = [1, 1]} : vector<16x64xf32> to vector<16x16xf32>
    %91 = vector.shape_cast %90 : vector<16x16xf32> to vector<2x8x16xf32>
    %92 = vector.extract_strided_slice %20 {offsets = [0, 48], sizes = [16, 16], strides = [1, 1]} : vector<16x64xf32> to vector<16x16xf32>
    %93 = vector.shape_cast %92 : vector<16x16xf32> to vector<2x8x16xf32>
    "tpu.trace_start"() <{level = 10 : i32, message = "bqd,bkd->bqk"}> : () -> ()
    %cst_42 = arith.constant dense<0.000000e+00> : vector<2x8x8xf32>
    %94 = tpu.matmul %89, %91, %cst_42 {dimension_numbers = #tpu.dot_dimension_numbers<[2], [2], [1], [1], [0, 0, 0, 1, 1, 1], [0], [0]>} : vector<2x8x16xf32>, vector<2x8x16xf32>, vector<2x8x8xf32> -> vector<2x8x8xf32>
    "tpu.trace_stop"() : () -> ()
    %cst_43 = arith.constant dense<0xFF800000> : vector<2x8xf32>
    %95 = vector.multi_reduction <maximumf>, %94, %cst_43 [2] : vector<2x8x8xf32> to vector<2x8xf32>
    %96 = vector.shape_cast %95 : vector<2x8xf32> to vector<2x8x1xf32>
    %97 = vector.broadcast %96 : vector<2x8x1xf32> to vector<2x8x8xf32>
    %98 = arith.subf %94, %97 : vector<2x8x8xf32>
    %99 = math.exp %98 : vector<2x8x8xf32>
    %cst_44 = arith.constant dense<0.000000e+00> : vector<2x8xf32>
    %100 = vector.multi_reduction <add>, %99, %cst_44 [2] : vector<2x8x8xf32> to vector<2x8xf32>
    %101 = vector.shape_cast %100 : vector<2x8xf32> to vector<2x8x1xf32>
    %102 = tpu.reciprocal %101 {approx = true} : vector<2x8x1xf32> -> vector<2x8x1xf32>
    %103 = vector.broadcast %102 : vector<2x8x1xf32> to vector<2x8x8xf32>
    %104 = arith.mulf %99, %103 : vector<2x8x8xf32>
    "tpu.trace_start"() <{level = 10 : i32, message = "bqk,bkd->bqd"}> : () -> ()
    %cst_45 = arith.constant dense<0.000000e+00> : vector<2x8x16xf32>
    %105 = tpu.matmul %104, %93, %cst_45 {dimension_numbers = #tpu.dot_dimension_numbers<[2], [1], [1], [2], [0, 0, 0, 1, 1, 2], [0], [0]>} : vector<2x8x8xf32>, vector<2x8x16xf32>, vector<2x8x16xf32> -> vector<2x8x16xf32>
    "tpu.trace_stop"() : () -> ()
    %106 = vector.shape_cast %105 : vector<2x8x16xf32> to vector<16x16xf32>
    %c48 = arith.constant 48 : index
    %c0_46 = arith.constant 0 : index
    %107 = vector.load %arg10[%c48, %c0_46] : memref<64x128xf32, #tpu.memory_space<vmem>>, vector<16x128xf32>
    %cst_47 = arith.constant dense<0.000000e+00> : vector<16x128xf32>
    %108 = tpu.matmul %106, %107, %cst_47 {dimension_numbers = #tpu.dot_dimension_numbers<[1], [0], [0], [1], [0, 0, 1, 1], [], []>} : vector<16x16xf32>, vector<16x128xf32>, vector<16x128xf32> -> vector<16x128xf32>
    %109 = arith.addf %87, %108 : vector<16x128xf32>
    %c0_48 = arith.constant 0 : index
    %c0_49 = arith.constant 0 : index
    %110 = vector.load %arg11[%c0_48, %c0_49] : memref<1x128xf32, #tpu.memory_space<vmem>>, vector<1x128xf32>
    %111 = vector.broadcast %110 : vector<1x128xf32> to vector<16x128xf32>
    %112 = arith.addf %109, %111 : vector<16x128xf32>
    %113 = vector.shape_cast %112 : vector<16x128xf32> to vector<2x8x128xf32>
    %c0_50 = arith.constant 0 : index
    %c0_51 = arith.constant 0 : index
    %c0_52 = arith.constant 0 : index
    %114 = vector.load %arg12[%c0_50, %c0_51, %c0_52] : memref<2x8x128xf32, #tpu.memory_space<vmem>>, vector<2x8x128xf32>
    tpu.vector_store %arg12[%c0_50, %c0_51, %c0_52], %113 {strides = array<i32>} : memref<2x8x128xf32, #tpu.memory_space<vmem>>, vector<2x8x128xf32>,
    return
  }
  func.func @transform_0(%arg0: i32) -> (i32, i32, i32) {
    %c0_i32 = arith.constant 0 : i32
    %c0_i32_0 = arith.constant 0 : i32
    %c0_i32_1 = arith.constant 0 : i32
    return %arg0, %c0_i32, %c0_i32_0 : i32, i32, i32
  }
  func.func @transform_1(%arg0: i32) -> (i32, i32, i32) {
    %c0_i32 = arith.constant 0 : i32
    %c0_i32_0 = arith.constant 0 : i32
    %c0_i32_1 = arith.constant 0 : i32
    return %arg0, %c0_i32, %c0_i32_0 : i32, i32, i32
  }
  func.func @transform_2(%arg0: i32) -> (i32, i32, i32) {
    %c0_i32 = arith.constant 0 : i32
    %c0_i32_0 = arith.constant 0 : i32
    %c0_i32_1 = arith.constant 0 : i32
    return %arg0, %c0_i32, %c0_i32_0 : i32, i32, i32
  }
  func.func @transform_3(%arg0: i32) -> (i32, i32) {
    %c0_i32 = arith.constant 0 : i32
    %c0_i32_0 = arith.constant 0 : i32
    %c0_i32_1 = arith.constant 0 : i32
    return %c0_i32, %c0_i32_0 : i32, i32
  }
  func.func @transform_4(%arg0: i32) -> (i32, i32) {
    %c0_i32 = arith.constant 0 : i32
    %c0_i32_0 = arith.constant 0 : i32
    %c0_i32_1 = arith.constant 0 : i32
    return %c0_i32, %c0_i32_0 : i32, i32
  }
  func.func @transform_5(%arg0: i32) -> (i32, i32) {
    %c0_i32 = arith.constant 0 : i32
    %c0_i32_0 = arith.constant 0 : i32
    %c0_i32_1 = arith.constant 0 : i32
    return %c0_i32, %c0_i32_0 : i32, i32
  }
  func.func @transform_6(%arg0: i32) -> (i32, i32) {
    %c0_i32 = arith.constant 0 : i32
    %c0_i32_0 = arith.constant 0 : i32
    %c0_i32_1 = arith.constant 0 : i32
    return %c0_i32, %c0_i32_0 : i32, i32
  }
  func.func @transform_7(%arg0: i32) -> (i32, i32) {
    %c0_i32 = arith.constant 0 : i32
    %c0_i32_0 = arith.constant 0 : i32
    %c0_i32_1 = arith.constant 0 : i32
    return %c0_i32, %c0_i32_0 : i32, i32
  }
  func.func @transform_8(%arg0: i32) -> (i32, i32) {
    %c0_i32 = arith.constant 0 : i32
    %c0_i32_0 = arith.constant 0 : i32
    %c0_i32_1 = arith.constant 0 : i32
    return %c0_i32, %c0_i32_0 : i32, i32
  }
  func.func @transform_9(%arg0: i32) -> (i32, i32) {
    %c0_i32 = arith.constant 0 : i32
    %c0_i32_0 = arith.constant 0 : i32
    %c0_i32_1 = arith.constant 0 : i32
    return %c0_i32, %c0_i32_0 : i32, i32
  }
  func.func @transform_10(%arg0: i32) -> (i32, i32) {
    %c0_i32 = arith.constant 0 : i32
    %c0_i32_0 = arith.constant 0 : i32
    %c0_i32_1 = arith.constant 0 : i32
    return %c0_i32, %c0_i32_0 : i32, i32
  }
  func.func @transform_11(%arg0: i32) -> (i32, i32, i32) {
    %c0_i32 = arith.constant 0 : i32
    %c0_i32_0 = arith.constant 0 : i32
    %c0_i32_1 = arith.constant 0 : i32
    return %arg0, %c0_i32, %c0_i32_0 : i32, i32, i32
  }
}

</mosaic_0001>

<bundles_post_ra>
// kernel: tpu_custom_call.1
= control target key start
LH: loop header
LB: loop body
LE: loop exit
PB: predicated region body
PF: predicated region fallthrough
CT: control target
= control target key end

     0   :  { %s2983_s0 = inlined_call_operand.vmem [shape: f32[2,8,128], index: 0, kind: input, shape index: {}]   ;;  %s2984_s1 = inlined_call_operand.vmem [shape: f32[2,8,128], index: 1, kind: input, shape index: {}]   ;;  %s2985_s2 = inlined_call_operand.vmem [shape: f32[2,8,128], index: 2, kind: input, shape index: {}]   ;;  %s2986_s3 = inlined_call_operand.vmem [shape: f32[128,64], index: 3, kind: input, shape index: {}]   ;;  %s2987_s4 = inlined_call_operand.vmem [shape: f32[1,64], index: 4, kind: input, shape index: {}]   ;;  %s2988_s5 = inlined_call_operand.vmem [shape: f32[128,64], index: 5, kind: input, shape index: {}]   ;;  %s2989_s6 = inlined_call_operand.vmem [shape: f32[1,64], index: 6, kind: input, shape index: {}]   ;;  %s2990_s7 = inlined_call_operand.vmem [shape: f32[128,64], index: 7, kind: input, shape index: {}]   ;;  %s2991_s8 = inlined_call_operand.vmem [shape: f32[1,64], index: 8, kind: input, shape index: {}]   ;;  %s2992_s9 = inlined_call_operand.vmem [shape: f32[64,128], index: 9, kind: input, shape index: {}]   ;;  %s2993_s10 = inlined_call_operand.vmem [shape: f32[1,128], index: 10, kind: input, shape index: {}]   ;;  %s2994_s11 = inlined_call_operand.hbm [shape: f32[2,8,128], index: 11, kind: output, shape index: {}]  }
   0x1   :  { %v143_v0 = vld [vmem:[%s2988_s5] sm:$0xff]  ;;  %v144_v1 = vld [vmem:[%s2988_s5 + $0x8] sm:$0xff]  ;;  %v145_v5 = vld [vmem:[%s2988_s5 + $0x10] sm:$0xff] }
   0x2   :  { %v45_v2 = vld [vmem:[%s2986_s3] sm:$0xff]  ;;  %v2399_v3 = vpack.c.bf16 %v144_v1, %v143_v0  ;;  %v46_v4 = vld [vmem:[%s2986_s3 + $0x8] sm:$0xff]  ;;  %v146_v6 = vld [vmem:[%s2988_s5 + $0x18] sm:$0xff] }
   0x3   :  { %v2367_v7 = vpack.c.bf16 %v46_v4, %v45_v2  ;;  %v2403_v8 = vpack.c.bf16 %v146_v6, %v145_v5  ;;  %v47_v9 = vld [vmem:[%s2986_s3 + $0x10] sm:$0xff]  ;;  %v48_v10 = vld [vmem:[%s2986_s3 + $0x18] sm:$0xff]  ;;  %v147_v11 = vld [vmem:[%s2988_s5 + $0x20] sm:$0xff] }
   0x4   :  { %2400 = vmatprep.subr.bf16.mxu1 %v2399_v3  ;;  %v2371_v12 = vpack.c.bf16 %v48_v10, %v47_v9  ;;  %v148_v13 = vld [vmem:[%s2988_s5 + $0x28] sm:$0xff]  ;;  %v49_v14 = vld [vmem:[%s2986_s3 + $0x20] sm:$0xff]  ;;  %v149_v18 = vld [vmem:[%s2988_s5 + $0x30] sm:$0xff] }
   0x5   :  { %v50_v15 = vld [vmem:[%s2986_s3 + $0x28] sm:$0xff]  ;;  %2402 = vmatpush3.bf16.msra.mxu1 %v2399_v3  ;;  %2368 = vmatprep.subr.bf16.mxu0 %v2367_v7  ;;  %v2407_v16 = vpack.c.bf16 %v148_v13, %v147_v11  ;;  %v150_v19 = vld [vmem:[%s2988_s5 + $0x38] sm:$0xff]  ;;  %v51_v20 = vld [vmem:[%s2986_s3 + $0x30] sm:$0xff] }
   0x6   :  { %2370 = vmatpush3.bf16.msra.mxu0 %v2367_v7  ;;  %2404 = vmatprep.subr.bf16.mxu1 %v2403_v8  ;;  %v2375_v17 = vpack.c.bf16 %v50_v15, %v49_v14  ;;  %v52_v21 = vld [vmem:[%s2986_s3 + $0x38] sm:$0xff]  ;;  %v2411_v22 = vpack.c.bf16 %v150_v19, %v149_v18  ;;  %v151_v24 = vld [vmem:[%s2988_s5 + $0x40] sm:$0xff]  ;;  %v152_v25 = vld [vmem:[%s2988_s5 + $0x48] sm:$0xff] }
   0x7   :  { %2372 = vmatprep.subr.bf16.mxu0 %v2371_v12  ;;  %v2379_v23 = vpack.c.bf16 %v52_v21, %v51_v20  ;;  %v41_v26 = vld [vmem:[%s2984_s1] sm:$0xff]  ;;  %v54_v28 = vld [vmem:[%s2986_s3 + $0x48] sm:$0xff] }
   0x8   :  { %v53_v27 = vld [vmem:[%s2986_s3 + $0x40] sm:$0xff]  ;;  %2221 = vmatprep.mubr.f32.mxu1 %v41_v26 }
   0x9   :  { %2406 = vmatpush3.bf16.msra.mxu1 %v2403_v8  ;;  %v39_v29 = vld [vmem:[%s2983_s0] sm:$0xff] }
   0xa   :  { %2374 = vmatpush3.bf16.msra.mxu0 %v2371_v12  ;;  %2408 = vmatprep.subr.bf16.mxu1 %v2407_v16 }
   0xb   :  { %2376 = vmatprep.subr.bf16.mxu0 %v2375_v17  ;;  %2186 = vmatprep.mubr.f32.mxu0 %v39_v29 }
   0xd   :  { %2410 = vmatpush3.bf16.msra.mxu1 %v2407_v16 }
   0xe   :  { %16 = vsyncpa [#allocation3], 0  ;;  %2378 = vmatpush3.bf16.msra.mxu0 %v2375_v17  ;;  %2412 = vmatprep.subr.bf16.mxu1 %v2411_v22  ;;  %v2415_v30 = vpack.c.bf16 %v152_v25, %v151_v24  ;;  %v2383_v31 = vpack.c.bf16 %v54_v28, %v53_v27  ;;  %v153_v32 = vld [vmem:[%s2988_s5 + $0x50] sm:$0xff]  ;;  %v154_v33 = vld [vmem:[%s2988_s5 + $0x58] sm:$0xff]  ;;  %v2549_v52 = vmov 0.0   ;;  %vm2550_vm0 = vmmov 0  }
   0xf   :  { %2380 = vmatprep.subr.bf16.mxu0 %v2379_v23  ;;  %v55_v34 = vld [vmem:[%s2986_s3 + $0x50] sm:$0xff]  ;;  %v56_v35 = vld [vmem:[%s2986_s3 + $0x58] sm:$0xff]  ;;  %v2419_v36 = vpack.c.bf16 %v154_v33, %v153_v32  ;;  %v155_v38 = vld [vmem:[%s2988_s5 + $0x60] sm:$0xff]  ;;  %vm339_vm1 = vcmask 130048   ;;  %vm492_vm2 = vcmask 64512   ;;  %s2552_s27 = smov 96  }
  0x10   :  { %v2387_v37 = vpack.c.bf16 %v56_v35, %v55_v34  ;;  %v156_v39 = vld [vmem:[%s2988_s5 + $0x68] sm:$0xff]  ;;  %v57_v40 = vld [vmem:[%s2986_s3 + $0x60] sm:$0xff]  ;;  %v157_v44 = vld [vmem:[%s2988_s5 + $0x70] sm:$0xff] }
  0x11   :  { %2414 = vmatpush3.bf16.msra.mxu1 %v2411_v22  ;;  %v58_v41 = vld [vmem:[%s2986_s3 + $0x68] sm:$0xff]  ;;  %v2423_v42 = vpack.c.bf16 %v156_v39, %v155_v38  ;;  %v158_v45 = vld [vmem:[%s2988_s5 + $0x78] sm:$0xff]  ;;  %v59_v46 = vld [vmem:[%s2986_s3 + $0x70] sm:$0xff] }
  0x12   :  { %2382 = vmatpush3.bf16.msra.mxu0 %v2379_v23  ;;  %2416 = vmatprep.subr.bf16.mxu1 %v2415_v30  ;;  %v2391_v43 = vpack.c.bf16 %v58_v41, %v57_v40  ;;  %v60_v47 = vld [vmem:[%s2986_s3 + $0x78] sm:$0xff]  ;;  %v2427_v48 = vpack.c.bf16 %v158_v45, %v157_v44  ;;  %v42_v50 = vld [vmem:[%s2984_s1 + $0x8] sm:$0xff]  ;;  %v2017_v53 = vld [vmem:[%s2989_s6] ss:$0 sm:$0xff] }
  0x13   :  { %2384 = vmatprep.subr.bf16.mxu0 %v2383_v31  ;;  %v2395_v49 = vpack.c.bf16 %v60_v47, %v59_v46  ;;  %v40_v51 = vld [vmem:[%s2983_s0 + $0x8] sm:$0xff]  ;;  %v2016_v55 = vld [vmem:[%s2987_s4] ss:$0 sm:$0xff]  ;;  %s2551_s0 = smov 112   ;;  %v243_v1 = vld [vmem:[%s2990_s7 + $0x10] sm:$0xff] }
  0x14   :  { %v241_v63 = vld [vmem:[%s2990_s7] sm:$0xff]  ;;  %v242_v0 = vld [vmem:[%s2990_s7 + $0x8] sm:$0xff]  ;;  %v244_v3 = vld [vmem:[%s2990_s7 + $0x18] sm:$0xff] }
  0x15   :  { %2418 = vmatpush3.bf16.msra.mxu1 %v2415_v30  ;;  %v2431_v2 = vpack.c.bf16 %v242_v0, %v241_v63  ;;  %v2435_v4 = vpack.c.bf16 %v244_v3, %v243_v1  ;;  %v245_v5 = vld [vmem:[%s2990_s7 + $0x20] sm:$0xff]  ;;  %v246_v6 = vld [vmem:[%s2990_s7 + $0x28] sm:$0xff]  ;;  %v247_v9 = vld [vmem:[%s2990_s7 + $0x30] sm:$0xff] }
  0x16   :  { %2386 = vmatpush3.bf16.msra.mxu0 %v2383_v31  ;;  %2420 = vmatprep.subr.bf16.mxu1 %v2419_v36  ;;  %v2439_v7 = vpack.c.bf16 %v246_v6, %v245_v5  ;;  %v43_v8 = vld [vmem:[%s2985_s2] sm:$0xff]  ;;  %v248_v10 = vld [vmem:[%s2990_s7 + $0x38] sm:$0xff]  ;;  %v250_v13 = vld [vmem:[%s2990_s7 + $0x48] sm:$0xff] }
  0x17   :  { %2388 = vmatprep.subr.bf16.mxu0 %v2387_v37  ;;  %v2443_v11 = vpack.c.bf16 %v248_v10, %v247_v9  ;;  %v249_v12 = vld [vmem:[%s2990_s7 + $0x40] sm:$0xff]  ;;  %v251_v15 = vld [vmem:[%s2990_s7 + $0x50] sm:$0xff]  ;;  %v252_v16 = vld [vmem:[%s2990_s7 + $0x58] sm:$0xff] }
  0x18   :  { %v2447_v14 = vpack.c.bf16 %v250_v13, %v249_v12  ;;  %v2451_v17 = vpack.c.bf16 %v252_v16, %v251_v15  ;;  %v253_v18 = vld [vmem:[%s2990_s7 + $0x60] sm:$0xff]  ;;  %v254_v19 = vld [vmem:[%s2990_s7 + $0x68] sm:$0xff]  ;;  %v255_v21 = vld [vmem:[%s2990_s7 + $0x70] sm:$0xff] }
  0x19   :  { %2422 = vmatpush3.bf16.msra.mxu1 %v2419_v36  ;;  %v2455_v20 = vpack.c.bf16 %v254_v19, %v253_v18  ;;  %v256_v22 = vld [vmem:[%s2990_s7 + $0x78] sm:$0xff]  ;;  %v44_v24 = vld [vmem:[%s2985_s2 + $0x8] sm:$0xff] }
  0x1a   :  { %2390 = vmatpush3.bf16.msra.mxu0 %v2387_v37  ;;  %2424 = vmatprep.subr.bf16.mxu1 %v2423_v42  ;;  %v2459_v23 = vpack.c.bf16 %v256_v22, %v255_v21  ;;  %v2018_v37 = vld [vmem:[%s2991_s8] ss:$0 sm:$0xff] }
  0x1b   :  { %2392 = vmatprep.subr.bf16.mxu0 %v2391_v43 }
  0x1d   :  { %2426 = vmatpush3.bf16.msra.mxu1 %v2423_v42 }
  0x1e   :  { %2394 = vmatpush3.bf16.msra.mxu0 %v2391_v43  ;;  %2428 = vmatprep.subr.bf16.mxu1 %v2427_v48 }
  0x1f   :  { %2396 = vmatprep.subr.bf16.mxu0 %v2395_v49 }
  0x21   :  { %2430 = vmatpush3.bf16.msra.mxu1 %v2427_v48 }
  0x22   :  { %2398 = vmatpush3.bf16.msra.mxu0 %v2395_v49  ;;  %2259 = vmatprep.subr.mxu1 %v2549_v52 }
  0x23   :  { %2432 = vmatprep.subr.bf16.mxu0 %v2431_v2 }
  0x24   :  { %2222 = vmatmul.mubr.f32.vlgmr.msra.gmra.mrb[0].mxu1 %v42_v50 }
  0x25   :  { %2187 = vmatmul.mubr.f32.vlgmr.msra.gmra.mrb[0].mxu0 %v40_v51  ;;  %2261 = vmatprep.mubr.msk.f32.mxu1 %vm2550_vm0, %v2549_v52 }
  0x26   :  { %2434 = vmatpush3.bf16.msra.mxu0 %v2431_v2  ;;  %2256 = vmatprep.mubr.f32.mxu0 %v43_v8 }
  0x27   :  { %2436 = vmatprep.subr.bf16.mxu0 %v2435_v4 }
  0x2a   :  { %2438 = vmatpush3.bf16.msra.mxu0 %v2435_v4 }
  0x2b   :  { %2440 = vmatprep.subr.bf16.mxu0 %v2439_v7 }
  0x2e   :  { %2442 = vmatpush3.bf16.msra.mxu0 %v2439_v7 }
  0x2f   :  { %2444 = vmatprep.subr.bf16.mxu0 %v2443_v11 }
  0x32   :  { %2446 = vmatpush3.bf16.msra.mxu0 %v2443_v11 }
  0x33   :  { %2448 = vmatprep.subr.bf16.mxu0 %v2447_v14 }
  0x36   :  { %2450 = vmatpush3.bf16.msra.mxu0 %v2447_v14 }
  0x37   :  { %2452 = vmatprep.subr.bf16.mxu0 %v2451_v17 }
  0x3a   :  { %2454 = vmatpush3.bf16.msra.mxu0 %v2451_v17 }
  0x3b   :  { %2456 = vmatprep.subr.bf16.mxu0 %v2455_v20 }
  0x3e   :  { %2458 = vmatpush3.bf16.msra.mxu0 %v2455_v20 }
  0x3f   :  { %2460 = vmatprep.subr.bf16.mxu0 %v2459_v23 }
  0x42   :  { %2462 = vmatpush3.bf16.msra.mxu0 %v2459_v23  ;;  %v995_v23 = vld [vmem:[%s2992_s9 + $0x10] sm:$0xff] }
  0x45   :  { %2257 = vmatmul.mubr.f32.vlgmr.msra.gmra.mrb[2].mxu0 %v44_v24  ;;  %v996_v24 = vld [vmem:[%s2992_s9 + $0x18] sm:$0xff] }
  0xf7   :  { %v2223_v54 = vpop.f32.mrb[0].mxu1 }
  0xf8   :  { %v232_v56 = vpop.f32.mrb[1].mxu1  ;;  %v2188_v57 = vpop.f32.mrb[0].mxu0  ;;  %v2743_v61 = vadd.f32 %v2223_v54, %v2017_v53 }
  0xf9   :  { %v2734_v58 = vadd.f32 %v2017_v53, %v232_v56  ;;  %v134_v59 = vpop.f32.mrb[1].mxu0  ;;  %v2751_v62 = vadd.f32 %v2188_v57, %v2016_v55  ;;  %v661_v57 = vld [vmem:[%s2992_s9] sm:$0xff] }
  0xfa   :  { %v2736_v60 = vadd.f32 %v2016_v55, %v134_v59  ;;  %v662_v59 = vld [vmem:[%s2992_s9 + $0x8] sm:$0xff] }
  0xfb   :  { %2260 = vmatpush3.xpose.msk.msra.mxu1 %vm339_vm1, %v2734_v58  ;;  %v2467_v63 = vpack.c.bf16 %v662_v59, %v661_v57 }
  0xfc   :  { %2264 = vmatprep.subr.mxu1 %v2549_v52  ;;  %663 = vrot.lane.b32.xlu1 %v2736_v60, %s2551_s0 }
  0xfd   :  { %2468 = vmatprep.subr.bf16.mxu0 %v2467_v63 }
  0xfe   :  { %2262 = vmatmul.mubr.msk.f32.vlgmr.msra.gmra.mrb[2].mxu1 %vm339_vm1, %v2736_v60  ;;  %2470 = vmatpush3.bf16.msra.mxu0 %v2467_v63  ;;  %v1489_v63 = vld [vmem:[%s2992_s9 + $0x20] sm:$0xff] }
  0xff   :  { %2265 = vmatpush3.xpose.msk.msra.mxu1 %vm339_vm1, %v2743_v61  ;;  %2266 = vmatprep.mubr.msk.f32.mxu1 %vm2550_vm0, %v2549_v52 }
 0x100   :  { %2269 = vmatprep.subr.mxu1 %v2549_v52  ;;  %2323 = vmatprep.subr.mxu0 %v2549_v52 }
 0x102   :  { %2267 = vmatmul.mubr.msk.f32.vlgmr.msra.gmra.mrb[4].mxu1 %vm339_vm1, %v2751_v62 }
 0x103   :  { %2271 = vmatprep.mubr.msk.f32.mxu1 %vm2550_vm0, %v2549_v52 }
 0x118   :  { %v2258_v36 = vpop.f32.mrb[2].mxu0 }
 0x119   :  { %v330_v38 = vpop.f32.mrb[3].mxu0  ;;  %v2824_v40 = vadd.f32 %v2258_v36, %v2018_v37 }
 0x11a   :  { %v2822_v39 = vadd.f32 %v2018_v37, %v330_v38 }
 0x11c   :  { %2270 = vmatpush3.msra.mxu1 %v2822_v39 }
 0x11d   :  { %2274 = vmatprep.subr.mxu1 %v2549_v52 }
 0x16e   :  { %v664_v46 = vpop.permute.xlu1 %663 }
 0x1d1   :  { %v412_v25 = vpop.f32.mrb[2].mxu1 }
 0x1d2   :  { %v2263_v26 = vpop.f32.mrb[3].mxu1  ;;  %v493_v27 = vsel %vm492_vm2, %v412_v25, -inf }
 0x1d3   :  { %494 = vmax.xlane.f32.xlu0 %v493_v27  ;;  %v2463_v27 = vpack.c.bf16 %v996_v24, %v995_v23 }
 0x1d5   :  { %v488_v28 = vpop.f32.mrb[4].mxu1 }
 0x1d6   :  { %v2268_v29 = vpop.f32.mrb[5].mxu1  ;;  %v496_v30 = vsel %vm492_vm2, %v488_v28, -inf }
 0x1d7   :  { %497 = vmax.xlane.f32.xlu0 %v496_v30 }
 0x1ed   :  { %665 = vrot.lane.b32.xlu0 %v2734_v58, %s2551_s0 }
 0x260   :  { %v495_v31 = vpop.xlane.xlu0 %494 }
 0x261   :  { %v499_v32 = vsub.f32 %v412_v25, %v495_v31 }
 0x263   :  { %v501_v33 = vmul.f32 1.442695, %v499_v32 }
 0x264   :  { %v498_v41 = vpop.xlane.xlu0 %497 }
 0x265   :  { %2493 = vpow2.f32 %v501_v33  ;;  %v500_v42 = vsub.f32 %v488_v28, %v498_v41 }
 0x267   :  { %v503_v43 = vmul.f32 1.442695, %v500_v42 }
 0x268   :  { %v666_v55 = vpop.permute.xlu0 %665 }
 0x269   :  { %2495 = vpow2.f32 %v503_v43 }
 0x26f   :  { %v2494_v34 = vpop.eup %2493 }
 0x270   :  { %v505_v35 = vsel %vm492_vm2, %v2494_v34, 0.0 }
 0x271   :  { %506 = vadd.xlane.f32.xlu1 %v505_v35 }
 0x273   :  { %v2496_v44 = vpop.eup %2495 }
 0x274   :  { %v508_v45 = vsel %vm492_vm2, %v2496_v44, 0.0 }
 0x282   :  { %743 = vrot.lane.b32.xlu1 %v2743_v61, %s2551_s0 }
 0x2a6   :  { %509 = vadd.xlane.f32.xlu1 %v508_v45 }
 0x2b7   :  { %741 = vrot.lane.b32.xlu1 %v2751_v62, %s2551_s0 }
 0x2fe   :  { %v507_v47 = vpop.xlane.xlu1 %506 }
 0x2ff   :  { %2497 = vrcp.f32 %v507_v47 }
 0x302   :  { %v744_v50 = vpop.permute.xlu1 %743 }
 0x309   :  { %v2498_v48 = vpop.eup %2497 }
 0x30a   :  { %v513_v49 = vmul.f32 %v2498_v48, %v2494_v34 }
 0x30c   :  { %2272 = vmatmul.mubr.msk.f32.vlgmr.msra.gmra.mrb[6].mxu1 %vm492_vm2, %v513_v49 }
 0x30d   :  { %2275 = vmatpush3.msra.mxu1 %v2824_v40  ;;  %2276 = vmatprep.mubr.msk.f32.mxu1 %vm2550_vm0, %v2549_v52 }
 0x30e   :  { %2279 = vmatprep.subr.mxu1 %v2549_v52 }
 0x333   :  { %v510_v51 = vpop.xlane.xlu1 %509 }
 0x334   :  { %2499 = vrcp.f32 %v510_v51 }
 0x337   :  { %v742_v56 = vpop.permute.xlu1 %741 }
 0x33e   :  { %v2500_v53 = vpop.eup %2499 }
 0x33f   :  { %v514_v54 = vmul.f32 %v2500_v53, %v2496_v44 }
 0x341   :  { %2277 = vmatmul.mubr.msk.f32.vlgmr.msra.gmra.mrb[8].mxu1 %vm492_vm2, %v514_v54 }
 0x342   :  { %2280 = vmatpush3.xpose.msk.msra.mxu1 %vm339_vm1, %v666_v55  ;;  %2281 = vmatprep.mubr.msk.f32.mxu1 %vm2550_vm0, %v2549_v52 }
 0x343   :  { %2284 = vmatprep.subr.mxu1 %v2549_v52 }
 0x345   :  { %2282 = vmatmul.mubr.msk.f32.vlgmr.msra.gmra.mrb[10].mxu1 %vm339_vm1, %v664_v46 }
 0x346   :  { %2285 = vmatpush3.xpose.msk.msra.mxu1 %vm339_vm1, %v744_v50  ;;  %2286 = vmatprep.mubr.msk.f32.mxu1 %vm2550_vm0, %v2549_v52 }
 0x347   :  { %2289 = vmatprep.subr.mxu1 %v2549_v52 }
 0x349   :  { %2287 = vmatmul.mubr.msk.f32.vlgmr.msra.gmra.mrb[12].mxu1 %vm339_vm1, %v742_v56 }
 0x34a   :  { %2291 = vmatprep.mubr.msk.f32.mxu1 %vm2550_vm0, %v2549_v52 }
 0x3df   :  { %v584_v0 = vpop.f32.mrb[6].mxu1 }
 0x3e0   :  { %v2273_v1 = vpop.f32.mrb[7].mxu1  ;;  %2310 = vmatprep.mubr.msk.f32.mxu0 %vm339_vm1, %v584_v0  ;;  %v1490_v0 = vld [vmem:[%s2992_s9 + $0x28] sm:$0xff] }
 0x414   :  { %v657_v2 = vpop.f32.mrb[8].mxu1 }
 0x415   :  { %v2278_v3 = vpop.f32.mrb[9].mxu1  ;;  %2311 = vmatmul.mubr.msk.f32.vlgmr.msra.gmra.mrb[4].mxu0 %vm339_vm1, %v657_v2  ;;  %v2471_v2 = vpack.c.bf16 %v1490_v0, %v1489_v63 }
 0x416   :  { %2325 = vmatprep.mubr.msk.f32.mxu0 %vm2550_vm0, %v2549_v52 }
 0x418   :  { %v737_v4 = vpop.f32.mrb[10].mxu1 }
 0x419   :  { %v2283_v5 = vpop.f32.mrb[11].mxu1  ;;  %v819_v6 = vsel %vm492_vm2, %v737_v4, -inf }
 0x41a   :  { %820 = vmax.xlane.f32.xlu0 %v819_v6 }
 0x41c   :  { %v815_v7 = vpop.f32.mrb[12].mxu1 }
 0x41d   :  { %v2288_v8 = vpop.f32.mrb[13].mxu1  ;;  %v822_v9 = vsel %vm492_vm2, %v815_v7, -inf }
 0x41e   :  { %823 = vmax.xlane.f32.xlu1 %v822_v9 }
 0x42f   :  { %919 = vrot.lane.b32.xlu1 %v2824_v40, %s2551_s0 }
 0x433   :  { %1161 = vrot.lane.b32.xlu1 %v2734_v58, %s2552_s27 }
 0x437   :  { %1159 = vrot.lane.b32.xlu1 %v2736_v60, %s2552_s27 }
 0x43b   :  { %1237 = vrot.lane.b32.xlu1 %v2751_v62, %s2552_s27 }
 0x4a7   :  { %v821_v10 = vpop.xlane.xlu0 %820 }
 0x4a8   :  { %v825_v11 = vsub.f32 %v737_v4, %v821_v10 }
 0x4aa   :  { %v827_v12 = vmul.f32 1.442695, %v825_v11 }
 0x4ab   :  { %v824_v13 = vpop.xlane.xlu1 %823 }
 0x4ac   :  { %2501 = vpow2.f32 %v827_v12  ;;  %v826_v14 = vsub.f32 %v815_v7, %v824_v13 }
 0x4ae   :  { %v829_v15 = vmul.f32 1.442695, %v826_v14 }
 0x4af   :  { %v920_v28 = vpop.permute.xlu1 %919 }
 0x4b0   :  { %2503 = vpow2.f32 %v829_v15 }
 0x4b3   :  { %v1162_v31 = vpop.permute.xlu1 %1161 }
 0x4b6   :  { %v2502_v16 = vpop.eup %2501 }
 0x4b7   :  { %v831_v17 = vsel %vm492_vm2, %v2502_v16, 0.0  ;;  %v1160_v36 = vpop.permute.xlu1 %1159 }
 0x4b8   :  { %832 = vadd.xlane.f32.xlu0 %v831_v17 }
 0x4ba   :  { %v2504_v18 = vpop.eup %2503 }
 0x4bb   :  { %v834_v19 = vsel %vm492_vm2, %v2504_v18, 0.0  ;;  %v1238_v38 = vpop.permute.xlu1 %1237 }
 0x4bc   :  { %835 = vadd.xlane.f32.xlu0 %v834_v19 }
 0x4d2   :  { %842 = vrot.lane.b32.xlu0 %v2822_v39, %s2551_s0  ;;  %s2553_s0 = smov 80  }
 0x4d6   :  { %1239 = vrot.lane.b32.xlu0 %v2743_v61, %s2552_s27 }
 0x545   :  { %v833_v20 = vpop.xlane.xlu0 %832 }
 0x546   :  { %2505 = vrcp.f32 %v833_v20 }
 0x549   :  { %v836_v21 = vpop.xlane.xlu0 %835 }
 0x54a   :  { %2507 = vrcp.f32 %v836_v21 }
 0x54d   :  { %v843_v22 = vpop.permute.xlu0 %842 }
 0x54e   :  { %2290 = vmatpush3.msra.mxu1 %v843_v22 }
 0x54f   :  { %2294 = vmatprep.subr.mxu1 %v2549_v52 }
 0x550   :  { %v2506_v25 = vpop.eup %2505 }
 0x551   :  { %v839_v26 = vmul.f32 %v2506_v25, %v2502_v16  ;;  %v1240_v37 = vpop.permute.xlu0 %1239 }
 0x553   :  { %2292 = vmatmul.mubr.msk.f32.vlgmr.msra.gmra.mrb[14].mxu1 %vm492_vm2, %v839_v26 }
 0x554   :  { %v2508_v29 = vpop.eup %2507  ;;  %2295 = vmatpush3.msra.mxu1 %v920_v28  ;;  %2296 = vmatprep.mubr.msk.f32.mxu1 %vm2550_vm0, %v2549_v52 }
 0x555   :  { %v840_v30 = vmul.f32 %v2508_v29, %v2504_v18  ;;  %2464 = vmatprep.subr.bf16.mxu1 %v2463_v27 }
 0x557   :  { %2297 = vmatmul.mubr.msk.f32.vlgmr.msra.gmra.mrb[16].mxu1 %vm492_vm2, %v840_v30 }
 0x558   :  { %2466 = vmatpush3.bf16.msra.mxu1 %v2463_v27 }
 0x559   :  { %2313 = vmatprep.subr.mxu1 %v2549_v52 }
 0x626   :  { %v914_v32 = vpop.f32.mrb[14].mxu1 }
 0x627   :  { %v2293_v33 = vpop.f32.mrb[15].mxu1  ;;  %2303 = vmatprep.mubr.msk.f32.mxu1 %vm339_vm1, %v914_v32 }
 0x62a   :  { %v991_v34 = vpop.f32.mrb[16].mxu1 }
 0x62b   :  { %v2298_v35 = vpop.f32.mrb[17].mxu1  ;;  %2304 = vmatmul.mubr.msk.f32.vlgmr.msra.gmra.mrb[18].mxu1 %vm339_vm1, %v991_v34 }
 0x62c   :  { %2314 = vmatpush3.xpose.msk.msra.mxu1 %vm339_vm1, %v1162_v31  ;;  %2315 = vmatprep.mubr.msk.f32.mxu1 %vm2550_vm0, %v2549_v52 }
 0x62d   :  { %2318 = vmatprep.subr.mxu1 %v2549_v52 }
 0x62f   :  { %2316 = vmatmul.mubr.msk.f32.vlgmr.msra.gmra.mrb[20].mxu1 %vm339_vm1, %v1160_v36 }
 0x630   :  { %2319 = vmatpush3.xpose.msk.msra.mxu1 %vm339_vm1, %v1240_v37  ;;  %2320 = vmatprep.mubr.msk.f32.mxu1 %vm2550_vm0, %v2549_v52  ;;  %v1904_v37 = vld [vmem:[%s2992_s9 + $0x30] sm:$0xff] }
 0x631   :  { %2328 = vmatprep.subr.mxu1 %v2549_v52 }
 0x633   :  { %2321 = vmatmul.mubr.msk.f32.vlgmr.msra.gmra.mrb[22].mxu1 %vm339_vm1, %v1238_v38 }
 0x634   :  { %2330 = vmatprep.mubr.msk.f32.mxu1 %vm2550_vm0, %v2549_v52 }
 0x6fe   :  { %v2902_v41 = vpop.f32.mrb[18].mxu1 }
 0x6ff   :  { %v2904_v42 = vpop.f32.mrb[19].mxu1 }
 0x702   :  { %v1233_v43 = vpop.f32.mrb[20].mxu1 }
 0x703   :  { %v2317_v44 = vpop.f32.mrb[21].mxu1  ;;  %v1315_v45 = vsel %vm492_vm2, %v1233_v43, -inf }
 0x704   :  { %1316 = vmax.xlane.f32.xlu0 %v1315_v45 }
 0x706   :  { %v1311_v46 = vpop.f32.mrb[22].mxu1 }
 0x707   :  { %v2322_v47 = vpop.f32.mrb[23].mxu1  ;;  %v1318_v48 = vsel %vm492_vm2, %v1311_v46, -inf }
 0x708   :  { %1319 = vmax.xlane.f32.xlu1 %v1318_v48  ;;  %v2051_v48 = vld [vmem:[%s2993_s10] ss:$0 sm:$0xff] }
 0x719   :  { %1413 = vrot.lane.b32.xlu1 %v2824_v40, %s2552_s27 }
 0x71d   :  { %1576 = vrot.lane.b32.xlu1 %v2734_v58, %s2553_s0 }
 0x721   :  { %1654 = vrot.lane.b32.xlu1 %v2743_v61, %s2553_s0 }
 0x725   :  { %1652 = vrot.lane.b32.xlu1 %v2751_v62, %s2553_s0 }
 0x791   :  { %v1317_v49 = vpop.xlane.xlu0 %1316 }
 0x792   :  { %v1321_v50 = vsub.f32 %v1233_v43, %v1317_v49 }
 0x794   :  { %v1323_v51 = vmul.f32 1.442695, %v1321_v50 }
 0x795   :  { %v1320_v53 = vpop.xlane.xlu1 %1319 }
 0x796   :  { %2509 = vpow2.f32 %v1323_v51  ;;  %v1322_v54 = vsub.f32 %v1311_v46, %v1320_v53 }
 0x798   :  { %v1325_v55 = vmul.f32 1.442695, %v1322_v54 }
 0x799   :  { %v1414_v56 = vpop.permute.xlu1 %1413 }
 0x79a   :  { %2511 = vpow2.f32 %v1325_v55  ;;  %2329 = vmatpush3.msra.mxu1 %v1414_v56 }
 0x79b   :  { %2340 = vmatprep.subr.mxu1 %v2549_v52 }
 0x79d   :  { %v1577_v7 = vpop.permute.xlu1 %1576 }
 0x7a0   :  { %v2510_v57 = vpop.eup %2509 }
 0x7a1   :  { %v1327_v58 = vsel %vm492_vm2, %v2510_v57, 0.0  ;;  %v1655_v11 = vpop.permute.xlu1 %1654 }
 0x7a2   :  { %1328 = vadd.xlane.f32.xlu0 %v1327_v58 }
 0x7a4   :  { %v2512_v61 = vpop.eup %2511 }
 0x7a5   :  { %v1330_v59 = vsel %vm492_vm2, %v2512_v61, 0.0  ;;  %v1653_v14 = vpop.permute.xlu1 %1652 }
 0x7a6   :  { %1331 = vadd.xlane.f32.xlu0 %v1330_v59 }
 0x7bc   :  { %1337 = vrot.lane.b32.xlu0 %v2822_v39, %s2552_s27 }
 0x7c0   :  { %1574 = vrot.lane.b32.xlu0 %v2736_v60, %s2553_s0 }
 0x82f   :  { %v1329_v62 = vpop.xlane.xlu0 %1328 }
 0x830   :  { %2513 = vrcp.f32 %v1329_v62 }
 0x833   :  { %v1332_v1 = vpop.xlane.xlu0 %1331 }
 0x834   :  { %2515 = vrcp.f32 %v1332_v1 }
 0x837   :  { %v1338_v3 = vpop.permute.xlu0 %1337 }
 0x838   :  { %2324 = vmatpush3.msra.mxu0 %v1338_v3 }
 0x839   :  { %2472 = vmatprep.subr.bf16.mxu0 %v2471_v2 }
 0x83a   :  { %v2514_v4 = vpop.eup %2513 }
 0x83b   :  { %v1335_v5 = vmul.f32 %v2514_v4, %v2510_v57  ;;  %v1575_v8 = vpop.permute.xlu0 %1574 }
 0x83d   :  { %2326 = vmatmul.mubr.msk.f32.vlgmr.msra.gmra.mrb[6].mxu0 %vm492_vm2, %v1335_v5 }
 0x83e   :  { %v2516_v60 = vpop.eup %2515  ;;  %2474 = vmatpush3.bf16.msra.mxu0 %v2471_v2 }
 0x83f   :  { %v1336_v6 = vmul.f32 %v2516_v60, %v2512_v61  ;;  %2345 = vmatprep.subr.mxu0 %v2549_v52 }
 0x841   :  { %2331 = vmatmul.mubr.msk.f32.vlgmr.msra.gmra.mrb[24].mxu1 %vm492_vm2, %v1336_v6 }
 0x842   :  { %2341 = vmatpush3.xpose.msk.msra.mxu1 %vm339_vm1, %v1577_v7  ;;  %2342 = vmatprep.mubr.msk.f32.mxu1 %vm2550_vm0, %v2549_v52 }
 0x843   :  { %2350 = vmatprep.subr.mxu1 %v2549_v52 }
 0x845   :  { %2343 = vmatmul.mubr.msk.f32.vlgmr.msra.gmra.mrb[26].mxu1 %vm339_vm1, %v1575_v8 }
 0x846   :  { %2352 = vmatprep.mubr.msk.f32.mxu1 %vm2550_vm0, %v2549_v52 }
 0x910   :  { %v1409_v9 = vpop.f32.mrb[6].mxu0 }
 0x911   :  { %v2327_v10 = vpop.f32.mrb[7].mxu0  ;;  %2337 = vmatprep.mubr.msk.f32.mxu0 %vm339_vm1, %v1409_v9 }
 0x914   :  { %v1485_v12 = vpop.f32.mrb[24].mxu1 }
 0x915   :  { %v2332_v13 = vpop.f32.mrb[25].mxu1  ;;  %2338 = vmatmul.mubr.msk.f32.vlgmr.msra.gmra.mrb[4].mxu0 %vm339_vm1, %v1485_v12 }
 0x916   :  { %2346 = vmatpush3.xpose.msk.msra.mxu0 %vm339_vm1, %v1655_v11  ;;  %2347 = vmatprep.mubr.msk.f32.mxu0 %vm2550_vm0, %v2549_v52 }
 0x917   :  { %2355 = vmatprep.subr.mxu0 %v2549_v52 }
 0x918   :  { %v1648_v15 = vpop.f32.mrb[26].mxu1 }
 0x919   :  { %v2344_v16 = vpop.f32.mrb[27].mxu1  ;;  %2348 = vmatmul.mubr.msk.f32.vlgmr.msra.gmra.mrb[8].mxu0 %vm339_vm1, %v1653_v14  ;;  %v1730_v17 = vsel %vm492_vm2, %v1648_v15, -inf }
 0x91a   :  { %1731 = vmax.xlane.f32.xlu0 %v1730_v17  ;;  %2357 = vmatprep.mubr.msk.f32.mxu0 %vm2550_vm0, %v2549_v52 }
 0x9a7   :  { %v1732_v18 = vpop.xlane.xlu0 %1731 }
 0x9a8   :  { %v1736_v19 = vsub.f32 %v1648_v15, %v1732_v18 }
 0x9aa   :  { %v1738_v20 = vmul.f32 1.442695, %v1736_v19 }
 0x9ac   :  { %2517 = vpow2.f32 %v1738_v20 }
 0x9b6   :  { %v2518_v21 = vpop.eup %2517 }
 0x9b7   :  { %v1742_v22 = vsel %vm492_vm2, %v2518_v21, 0.0 }
 0x9b8   :  { %1743 = vadd.xlane.f32.xlu0 %v1742_v22 }
 0x9ec   :  { %v1726_v23 = vpop.f32.mrb[8].mxu0 }
 0x9ed   :  { %v2349_v24 = vpop.f32.mrb[9].mxu0  ;;  %v1733_v25 = vsel %vm492_vm2, %v1726_v23, -inf }
 0x9ee   :  { %1734 = vmax.xlane.f32.xlu1 %v1733_v25 }
 0x9ff   :  { %1828 = vrot.lane.b32.xlu1 %v2824_v40, %s2553_s0 }
 0xa45   :  { %v1744_v31 = vpop.xlane.xlu0 %1743 }
 0xa7b   :  { %v1735_v26 = vpop.xlane.xlu1 %1734 }
 0xa7c   :  { %v1737_v27 = vsub.f32 %v1726_v23, %v1735_v26 }
 0xa7e   :  { %v1740_v28 = vmul.f32 1.442695, %v1737_v27 }
 0xa7f   :  { %v1829_v52 = vpop.permute.xlu1 %1828 }
 0xa80   :  { %2519 = vpow2.f32 %v1740_v28  ;;  %2356 = vmatpush3.msra.mxu0 %v1829_v52 }
 0xa81   :  { %2521 = vrcp.f32 %v1744_v31 }
 0xa8a   :  { %v2520_v29 = vpop.eup %2519 }
 0xa8b   :  { %v1745_v30 = vsel %vm492_vm2, %v2520_v29, 0.0  ;;  %v2522_v33 = vpop.eup %2521 }
 0xa8c   :  { %1746 = vadd.xlane.f32.xlu0 %v1745_v30  ;;  %v1750_v34 = vmul.f32 %v2522_v33, %v2518_v21 }
 0xaa2   :  { %1752 = vrot.lane.b32.xlu0 %v2822_v39, %s2553_s0  ;;  %v1905_v39 = vld [vmem:[%s2992_s9 + $0x38] sm:$0xff]  ;;  %s2554_s9 = smov [#allocation2]  }
 0xaa3   :  { %v2475_v38 = vpack.c.bf16 %v1905_v39, %v1904_v37  ;;  %s2005_s18 = sshll.u32 %s2554_s9, 4  ;;  %s2006_s18 = int_to_ptr.vmem [resolvable:$true] %s2005_s18 }
 0xaa4   :  { %s2525_s19 = scalar_lea.vmem %s2006_s18, 256  ;;  %p2530_p1 = scmp.lt.s32.totalorder %s2006_s18, %s2006_s18 }
 0xaa5   :  { %2476 = vmatprep.subr.bf16.mxu0 %v2475_v38  ;;  %p2526_p0 = scmp.ne.s32.totalorder %s2006_s18, %s2525_s19  ;;  %p2531_p2 = scmp.lt.s32.totalorder %s2525_s19, %s2525_s19 }
 0xaa7   :  { %p2532_p3 = por %p2531_p2, %p2530_p1 }
 0xaa9   :  { %p2533_p4 = pnand %p2532_p3, %p2526_p0 }
 0xb19   :  { %v1747_v32 = vpop.xlane.xlu0 %1746 }
 0xb1a   :  { %2523 = vrcp.f32 %v1747_v32 }
 0xb1d   :  { %v1753_v40 = vpop.permute.xlu0 %1752 }
 0xb1e   :  { %2351 = vmatpush3.msra.mxu1 %v1753_v40 }
 0xb1f   :  { %2353 = vmatmul.mubr.msk.f32.vlgmr.msra.gmra.mrb[28].mxu1 %vm492_vm2, %v1750_v34 }
 0xb24   :  { %v2524_v35 = vpop.eup %2523 }
 0xb25   :  { %v1751_v36 = vmul.f32 %v2524_v35, %v2520_v29 }
 0xb27   :  { %2358 = vmatmul.mubr.msk.f32.vlgmr.msra.gmra.mrb[10].mxu0 %vm492_vm2, %v1751_v36 }
 0xb28   :  { %2478 = vmatpush3.bf16.msra.mxu0 %v2475_v38 }
 0xbf2   :  { %v1824_v43 = vpop.f32.mrb[28].mxu1 }
 0xbf3   :  { %v2354_v44 = vpop.f32.mrb[29].mxu1  ;;  %2364 = vmatprep.mubr.msk.f32.mxu0 %vm339_vm1, %v1824_v43 }
 0xbfa   :  { %v1900_v45 = vpop.f32.mrb[10].mxu0 }
 0xbfb   :  { %v2359_v46 = vpop.f32.mrb[11].mxu0  ;;  %2365 = vmatmul.mubr.msk.f32.vlgmr.msra.gmra.mrb[4].mxu0 %vm339_vm1, %v1900_v45 }
 0xcce   :  { %v2366_v47 = vpop.f32.mrb[4].mxu0 }
 0xccf   :  { %v2479_v49 = vadd.f32 %v2366_v47, %v2902_v41  ;;  %v1978_v50 = vpop.f32.mrb[5].mxu0 }
 0xcd0   :  { %v2480_v51 = vadd.f32 %v1978_v50, %v2904_v42 }
 0xcd1   :  { %v1997_v53 = vadd.f32 %v2479_v49, %v2051_v48 }
 0xcd2   :  { %v1996_v54 = vadd.f32 %v2480_v51, %v2051_v48 }
 0xcd3   :  { %1999 = vst [vmem:[#allocation2 + $0x8] sm:$0xff] %v1997_v53 }
 0xcd4   :  { %1998 = vst [vmem:[#allocation2] sm:$0xff] %v1996_v54 }
 0xcd5   :  { %2536 = shalt.err (!%p2533_p4)
}
 0xcd6   :  { %s2537_s21 = scalar_lea.hbm %s2994_s11, 256 }
 0xcd7   :  { %p2538_p5 = scmp.ne.s32.totalorder %s2994_s11, %s2537_s21  ;;  %p2541_p6 = scmp.lt.u32.totalorder %s2537_s21, %s2994_s11 }
 0xcd9   :  { %p2543_p7 = pnand %p2541_p6, %p2538_p5 }
 0xcdb   :  { %2546 = shalt.err (!%p2543_p7)
}
 0xcdc   :  { %s2555_s8 = smov 128   ;;  %s2556_s24 = smov 8  }
 0xcdd   :  { %2011 = dma.vmem_to_hbm [thread:$0]  %s2006_s18, 256, %s2994_s11, [#allocation3], %s2555_s8, %s2555_s8, %s2556_s24  }
 0xcde   :  { %2547 = dma.done.wait [#allocation3], 256  }
 0xcdf   :  { %2548 = vsyncadd [#allocation3], 4294967040 }
 0xce0   :  { %2015 = vsyncpa [#allocation3], 1 }

</bundles_post_ra>
